<compile_context>
chip_gen: v6e
topology: v6e:2x2x1
jax: 0.10.0
libtpu: 0.0.40
codegen_flags: <defaults>
</compile_context>

<pallas_src>
import functools

import jax
import jax.numpy as jnp
from jax import lax
from jax.experimental import pallas as pl
from jax.experimental.pallas import tpu as pltpu


def _ghu_kernel(x_ref, w_ref, b_ref, mask_ref, out_ref, xpad_ref, col_ref,
                *, kh_size, kw_size, num_features, img_w, data_off, pad_lo,
                nb):
    """GHU.forward(x, None) for `nb` batch elements per grid step.

    x_ref    : (nb, C, HW)        flattened NCHW input block
    w_ref    : (2C, kh*kw*C)      im2col-reshaped conv_x weight
    b_ref    : (2C, 1)            fused bias  b_x + b_z
    mask_ref : (kw, 1, HW)        per-kw-tap row-wrap validity mask (1.0/0.0)
    out_ref  : (nb, C, HW)
    xpad_ref : (nb, C, L)         VMEM scratch: zero-padded flattened input
    col_ref  : (kh*kw*C, nb*HW)   VMEM scratch: im2col matrix
    """
    C = num_features
    HW = out_ref.shape[-1]
    L = xpad_ref.shape[-1]
    tail = L - data_off - HW
    pw = kw_size // 2

    # Zero only the (lane-aligned) padding regions, then copy x in with an
    # aligned, unmasked store (data_off is a multiple of 128).
    xpad_ref[:, :, :data_off] = jnp.zeros((nb, C, data_off), jnp.float32)
    xpad_ref[:, :, data_off + HW:] = jnp.zeros((nb, C, tail), jnp.float32)
    xpad_ref[:, :, data_off:data_off + HW] = x_ref[...].astype(jnp.float32)

    # Build the im2col matrix: each tap is a lane-shifted slice of the padded
    # input; horizontal taps get a mask that zeroes columns whose source
    # wrapped across image rows.
    for b in range(nb):
        for dh in range(kh_size):
            for dw in range(kw_size):
                t = dh * kw_size + dw
                start = data_off - pad_lo + dh * img_w + dw
                xs = xpad_ref[b, :, start:start + HW]
                if dw != pw:
                    xs = xs * mask_ref[dw]
                col_ref[t * C:(t + 1) * C, b * HW:(b + 1) * HW] = xs

    # Single MXU matmul (K = kh*kw*C); bias added in registers (no VMEM
    # accumulator round trips).
    gates = jnp.dot(w_ref[...], col_ref[...],
                    preferred_element_type=jnp.float32) + b_ref[...]
    p = jnp.tanh(gates[:C, :])
    u = jax.nn.sigmoid(gates[C:, :])
    # z == 0  =>  z_new = u * p + (1 - u) * 0 = u * p
    znew = (u * p).astype(out_ref.dtype)
    for b in range(nb):
        out_ref[b] = znew[:, b * HW:(b + 1) * HW]


def ghu_forward_nchw(x_nchw, w_x_oihw, b_x, b_z, kernel_size,
                     max_grid_steps=2):
    """Matches GHU.forward(x, None). w_x_oihw: (2C, C, kh, kw); b_*: (2C,)."""
    N, C, H, W = x_nchw.shape
    kh, kw = kernel_size
    assert kh % 2 == 1 and kw % 2 == 1, "odd kernel sizes only (SAME padding)"
    ph, pw = kh // 2, kw // 2
    HW = H * W
    two_c = 2 * C
    K = kh * kw * C
    pad_lo = ph * W + pw                      # zeros needed before the data
    # Lane-aligned data offset / tail (>= required padding, multiple of 128).
    data_off = max(128, -(-pad_lo // 128) * 128)
    tail = max(128, -(-pad_lo // 128) * 128)
    L = data_off + HW + tail

    # Grid: at most `max_grid_steps` parallel steps (so v7x's two TensorCores
    # both get work); remaining batch is folded into the lane axis per step.
    if max_grid_steps >= 1 and N % max_grid_steps == 0:
        G = max_grid_steps
    else:
        G = N
    NB = N // G

    # Flatten spatial dims; layout-preserving for NCHW (H*W -> lanes).
    x_flat = x_nchw.reshape(N, C, HW)

    # OIHW -> (2C, kh*kw*C), K ordered as (dh, dw, in_channel) to match the
    # im2col buffer.
    w2 = jnp.transpose(w_x_oihw, (0, 2, 3, 1)).reshape(two_c, K)
    w2 = w2.astype(jnp.float32)

    # conv_z(zeros) contributes only its bias -> fuse once in the wrapper.
    b_fused = (b_x + b_z).reshape(two_c, 1).astype(jnp.float32)

    # Row-wrap masks: a flattened shift by (dw - pw) pulls elements across
    # image-row boundaries; those output columns must be zeroed.
    w_idx = jnp.arange(HW, dtype=jnp.int32) % W
    masks = []
    for dw in range(kw):
        shift = dw - pw
        valid = jnp.logical_and(w_idx + shift >= 0, w_idx + shift < W)
        masks.append(valid.astype(jnp.float32))
    mask = jnp.stack(masks).reshape(kw, 1, HW)

    kernel = functools.partial(
        _ghu_kernel, kh_size=kh, kw_size=kw, num_features=C, img_w=W,
        data_off=data_off, pad_lo=pad_lo, nb=NB)

    out_flat = pl.pallas_call(
        kernel,
        out_shape=jax.ShapeDtypeStruct((N, C, HW), x_nchw.dtype),
        grid_spec=pltpu.PrefetchScalarGridSpec(
            num_scalar_prefetch=0,
            grid=(G,),
            in_specs=[
                pl.BlockSpec((NB, C, HW), lambda g: (g, 0, 0)),
                pl.BlockSpec((two_c, K), lambda g: (0, 0)),
                pl.BlockSpec((two_c, 1), lambda g: (0, 0)),
                pl.BlockSpec((kw, 1, HW), lambda g: (0, 0, 0)),
            ],
            out_specs=pl.BlockSpec((NB, C, HW), lambda g: (g, 0, 0)),
            scratch_shapes=[
                pltpu.VMEM((NB, C, L), jnp.float32),      # padded input
                pltpu.VMEM((K, NB * HW), jnp.float32),    # im2col buffer
            ],
        ),
        compiler_params=pltpu.CompilerParams(
            dimension_semantics=("parallel",)),
    )(x_flat, w2, b_fused, mask)

    return out_flat.reshape(N, C, H, W)


def _reference_nchw(x, w_x, w_z, b_x, b_z):
    """Pure-JAX reference (lax conv, NCHW) for correctness checking."""
    C = w_x.shape[1]
    z = jnp.zeros_like(x)
    dn = lax.conv_dimension_numbers(x.shape, w_x.shape,
                                    ("NCHW", "OIHW", "NCHW"))
    xc = lax.conv_general_dilated(x, w_x, (1, 1), "SAME",
                                  dimension_numbers=dn) + b_x.reshape(1, -1, 1, 1)
    zc = lax.conv_general_dilated(z, w_z, (1, 1), "SAME",
                                  dimension_numbers=dn) + b_z.reshape(1, -1, 1, 1)
    gates = xc + zc
    p = jnp.tanh(gates[:, :C])
    u = jax.nn.sigmoid(gates[:, C:])
    return u * p + (1.0 - u) * z


if __name__ == "__main__":
    # Small shapes consistent with the module: batch=2, num_features=4, 16x16.
    N, C, H, W = 2, 4, 16, 16
    kernel_size = (3, 3)
    kh, kw = kernel_size

    key = jax.random.PRNGKey(0)
    k_x, k_wz, k_wx, k_bz, k_bx = jax.random.split(key, 5)

    x_nchw = jax.random.normal(k_x, (N, C, H, W), dtype=jnp.float32)

    # Conv2d parameters in PyTorch OIHW layout: (out=2C, in=C, kh, kw) + bias.
    scale = 0.1
    w_z = scale * jax.random.normal(k_wz, (2 * C, C, kh, kw), dtype=jnp.float32)
    w_x = scale * jax.random.normal(k_wx, (2 * C, C, kh, kw), dtype=jnp.float32)
    b_z = scale * jax.random.normal(k_bz, (2 * C,), dtype=jnp.float32)
    b_x = scale * jax.random.normal(k_bx, (2 * C,), dtype=jnp.float32)

    # w_z does not affect the output (conv_z of zeros), only b_z does.
    out = ghu_forward_nchw(x_nchw, w_x, b_x, b_z, kernel_size)
    out = jax.block_until_ready(out)

    ref = _reference_nchw(x_nchw, w_x, w_z, b_x, b_z)
    assert out.shape == (N, C, H, W)
    assert jnp.allclose(out, ref, atol=1e-5, rtol=1e-5)

    print("KERNEL_OK")
</pallas_src>

<mosaic_0001>
module attributes {stable_mosaic.version = 11 : i64} {
  func.func @_ghu_kernel(%arg0: i32, %arg1: memref<1x4x256xf32, #tpu.memory_space<vmem>>, %arg2: memref<8x36xf32, #tpu.memory_space<vmem>>, %arg3: memref<8x1xf32, #tpu.memory_space<vmem>>, %arg4: memref<3x1x256xf32, #tpu.memory_space<vmem>>, %arg5: memref<1x4x256xf32, #tpu.memory_space<vmem>>, %arg6: memref<1x4x512xf32, #tpu.memory_space<vmem>>, %arg7: memref<36x256xf32, #tpu.memory_space<vmem>>) attributes {dimension_semantics = [#tpu.dimension_semantics<parallel>], iteration_bounds = array<i64: 2>, scalar_prefetch = 0 : i64, scratch_operands = 2 : i64, tpu.core_type = #tpu.core_type<tc>, window_params = [{transform_indices = @transform_0, window_bounds = array<i64: 1, 4, 256>}, {pipeline_mode = #tpu.pipeline_mode<synchronous>, transform_indices = @transform_1, window_bounds = array<i64: 8, 36>}, {pipeline_mode = #tpu.pipeline_mode<synchronous>, transform_indices = @transform_2, window_bounds = array<i64: 8, 1>}, {pipeline_mode = #tpu.pipeline_mode<synchronous>, transform_indices = @transform_3, window_bounds = array<i64: 3, 1, 256>}, {transform_indices = @transform_4, window_bounds = array<i64: 1, 4, 256>}]} {
    %cst = arith.constant 0.000000e+00 : f32
    %0 = vector.broadcast %cst : f32 to vector<1x4x128xf32>
    %c0 = arith.constant 0 : index
    %c0_0 = arith.constant 0 : index
    %c0_1 = arith.constant 0 : index
    %1 = vector.load %arg6[%c0, %c0_0, %c0_1] : memref<1x4x512xf32, #tpu.memory_space<vmem>>, vector<1x4x128xf32>
    tpu.vector_store %arg6[%c0, %c0_0, %c0_1], %0 {strides = array<i32>} : memref<1x4x512xf32, #tpu.memory_space<vmem>>, vector<1x4x128xf32>,
    %cst_2 = arith.constant 0.000000e+00 : f32
    %2 = vector.broadcast %cst_2 : f32 to vector<1x4x128xf32>
    %c0_3 = arith.constant 0 : index
    %c0_4 = arith.constant 0 : index
    %c384 = arith.constant 384 : index
    %3 = vector.load %arg6[%c0_3, %c0_4, %c384] : memref<1x4x512xf32, #tpu.memory_space<vmem>>, vector<1x4x128xf32>
    tpu.vector_store %arg6[%c0_3, %c0_4, %c384], %2 {strides = array<i32>} : memref<1x4x512xf32, #tpu.memory_space<vmem>>, vector<1x4x128xf32>,
    %c0_5 = arith.constant 0 : index
    %c0_6 = arith.constant 0 : index
    %c0_7 = arith.constant 0 : index
    %4 = vector.load %arg1[%c0_5, %c0_6, %c0_7] : memref<1x4x256xf32, #tpu.memory_space<vmem>>, vector<1x4x256xf32>
    %c0_8 = arith.constant 0 : index
    %c0_9 = arith.constant 0 : index
    %c128 = arith.constant 128 : index
    %5 = vector.load %arg6[%c0_8, %c0_9, %c128] : memref<1x4x512xf32, #tpu.memory_space<vmem>>, vector<1x4x256xf32>
    tpu.vector_store %arg6[%c0_8, %c0_9, %c128], %4 {strides = array<i32>} : memref<1x4x512xf32, #tpu.memory_space<vmem>>, vector<1x4x256xf32>,
    %c0_10 = arith.constant 0 : index
    %c0_11 = arith.constant 0 : index
    %c111 = arith.constant 111 : index
    %6 = vector.load %arg6[%c0_10, %c0_11, %c111] : memref<1x4x512xf32, #tpu.memory_space<vmem>>, vector<1x4x256xf32>
    %7 = vector.shape_cast %6 : vector<1x4x256xf32> to vector<4x256xf32>
    %c0_12 = arith.constant 0 : index
    %c0_13 = arith.constant 0 : index
    %c0_14 = arith.constant 0 : index
    %8 = vector.load %arg4[%c0_12, %c0_13, %c0_14] : memref<3x1x256xf32, #tpu.memory_space<vmem>>, vector<1x1x256xf32>
    %9 = vector.shape_cast %8 : vector<1x1x256xf32> to vector<1x256xf32>
    %10 = vector.broadcast %9 : vector<1x256xf32> to vector<4x256xf32>
    %11 = arith.mulf %7, %10 : vector<4x256xf32>
    %c0_15 = arith.constant 0 : index
    %c0_16 = arith.constant 0 : index
    %12 = vector.load %arg7[%c0_15, %c0_16] : memref<36x256xf32, #tpu.memory_space<vmem>>, vector<4x256xf32>
    tpu.vector_store %arg7[%c0_15, %c0_16], %11 {strides = array<i32>} : memref<36x256xf32, #tpu.memory_space<vmem>>, vector<4x256xf32>,
    %c0_17 = arith.constant 0 : index
    %c0_18 = arith.constant 0 : index
    %c112 = arith.constant 112 : index
    %13 = vector.load %arg6[%c0_17, %c0_18, %c112] : memref<1x4x512xf32, #tpu.memory_space<vmem>>, vector<1x4x256xf32>
    %14 = vector.shape_cast %13 : vector<1x4x256xf32> to vector<4x256xf32>
    %c4 = arith.constant 4 : index
    %c0_19 = arith.constant 0 : index
    %15 = vector.load %arg7[%c4, %c0_19] : memref<36x256xf32, #tpu.memory_space<vmem>>, vector<4x256xf32>
    tpu.vector_store %arg7[%c4, %c0_19], %14 {strides = array<i32>} : memref<36x256xf32, #tpu.memory_space<vmem>>, vector<4x256xf32>,
    %c0_20 = arith.constant 0 : index
    %c0_21 = arith.constant 0 : index
    %c113 = arith.constant 113 : index
    %16 = vector.load %arg6[%c0_20, %c0_21, %c113] : memref<1x4x512xf32, #tpu.memory_space<vmem>>, vector<1x4x256xf32>
    %17 = vector.shape_cast %16 : vector<1x4x256xf32> to vector<4x256xf32>
    %c2 = arith.constant 2 : index
    %c0_22 = arith.constant 0 : index
    %c0_23 = arith.constant 0 : index
    %18 = vector.load %arg4[%c2, %c0_22, %c0_23] : memref<3x1x256xf32, #tpu.memory_space<vmem>>, vector<1x1x256xf32>
    %19 = vector.shape_cast %18 : vector<1x1x256xf32> to vector<1x256xf32>
    %20 = vector.broadcast %19 : vector<1x256xf32> to vector<4x256xf32>
    %21 = arith.mulf %17, %20 : vector<4x256xf32>
    %c8 = arith.constant 8 : index
    %c0_24 = arith.constant 0 : index
    %22 = vector.load %arg7[%c8, %c0_24] : memref<36x256xf32, #tpu.memory_space<vmem>>, vector<4x256xf32>
    tpu.vector_store %arg7[%c8, %c0_24], %21 {strides = array<i32>} : memref<36x256xf32, #tpu.memory_space<vmem>>, vector<4x256xf32>,
    %c0_25 = arith.constant 0 : index
    %c0_26 = arith.constant 0 : index
    %c127 = arith.constant 127 : index
    %23 = vector.load %arg6[%c0_25, %c0_26, %c127] : memref<1x4x512xf32, #tpu.memory_space<vmem>>, vector<1x4x256xf32>
    %24 = vector.shape_cast %23 : vector<1x4x256xf32> to vector<4x256xf32>
    %c0_27 = arith.constant 0 : index
    %c0_28 = arith.constant 0 : index
    %c0_29 = arith.constant 0 : index
    %25 = vector.load %arg4[%c0_27, %c0_28, %c0_29] : memref<3x1x256xf32, #tpu.memory_space<vmem>>, vector<1x1x256xf32>
    %26 = vector.shape_cast %25 : vector<1x1x256xf32> to vector<1x256xf32>
    %27 = vector.broadcast %26 : vector<1x256xf32> to vector<4x256xf32>
    %28 = arith.mulf %24, %27 : vector<4x256xf32>
    %c12 = arith.constant 12 : index
    %c0_30 = arith.constant 0 : index
    %29 = vector.load %arg7[%c12, %c0_30] : memref<36x256xf32, #tpu.memory_space<vmem>>, vector<4x256xf32>
    tpu.vector_store %arg7[%c12, %c0_30], %28 {strides = array<i32>} : memref<36x256xf32, #tpu.memory_space<vmem>>, vector<4x256xf32>,
    %c0_31 = arith.constant 0 : index
    %c0_32 = arith.constant 0 : index
    %c128_33 = arith.constant 128 : index
    %30 = vector.load %arg6[%c0_31, %c0_32, %c128_33] : memref<1x4x512xf32, #tpu.memory_space<vmem>>, vector<1x4x256xf32>
    %31 = vector.shape_cast %30 : vector<1x4x256xf32> to vector<4x256xf32>
    %c16 = arith.constant 16 : index
    %c0_34 = arith.constant 0 : index
    %32 = vector.load %arg7[%c16, %c0_34] : memref<36x256xf32, #tpu.memory_space<vmem>>, vector<4x256xf32>
    tpu.vector_store %arg7[%c16, %c0_34], %31 {strides = array<i32>} : memref<36x256xf32, #tpu.memory_space<vmem>>, vector<4x256xf32>,
    %c0_35 = arith.constant 0 : index
    %c0_36 = arith.constant 0 : index
    %c129 = arith.constant 129 : index
    %33 = vector.load %arg6[%c0_35, %c0_36, %c129] : memref<1x4x512xf32, #tpu.memory_space<vmem>>, vector<1x4x256xf32>
    %34 = vector.shape_cast %33 : vector<1x4x256xf32> to vector<4x256xf32>
    %c2_37 = arith.constant 2 : index
    %c0_38 = arith.constant 0 : index
    %c0_39 = arith.constant 0 : index
    %35 = vector.load %arg4[%c2_37, %c0_38, %c0_39] : memref<3x1x256xf32, #tpu.memory_space<vmem>>, vector<1x1x256xf32>
    %36 = vector.shape_cast %35 : vector<1x1x256xf32> to vector<1x256xf32>
    %37 = vector.broadcast %36 : vector<1x256xf32> to vector<4x256xf32>
    %38 = arith.mulf %34, %37 : vector<4x256xf32>
    %c20 = arith.constant 20 : index
    %c0_40 = arith.constant 0 : index
    %39 = vector.load %arg7[%c20, %c0_40] : memref<36x256xf32, #tpu.memory_space<vmem>>, vector<4x256xf32>
    tpu.vector_store %arg7[%c20, %c0_40], %38 {strides = array<i32>} : memref<36x256xf32, #tpu.memory_space<vmem>>, vector<4x256xf32>,
    %c0_41 = arith.constant 0 : index
    %c0_42 = arith.constant 0 : index
    %c143 = arith.constant 143 : index
    %40 = vector.load %arg6[%c0_41, %c0_42, %c143] : memref<1x4x512xf32, #tpu.memory_space<vmem>>, vector<1x4x256xf32>
    %41 = vector.shape_cast %40 : vector<1x4x256xf32> to vector<4x256xf32>
    %c0_43 = arith.constant 0 : index
    %c0_44 = arith.constant 0 : index
    %c0_45 = arith.constant 0 : index
    %42 = vector.load %arg4[%c0_43, %c0_44, %c0_45] : memref<3x1x256xf32, #tpu.memory_space<vmem>>, vector<1x1x256xf32>
    %43 = vector.shape_cast %42 : vector<1x1x256xf32> to vector<1x256xf32>
    %44 = vector.broadcast %43 : vector<1x256xf32> to vector<4x256xf32>
    %45 = arith.mulf %41, %44 : vector<4x256xf32>
    %c24 = arith.constant 24 : index
    %c0_46 = arith.constant 0 : index
    %46 = vector.load %arg7[%c24, %c0_46] : memref<36x256xf32, #tpu.memory_space<vmem>>, vector<4x256xf32>
    tpu.vector_store %arg7[%c24, %c0_46], %45 {strides = array<i32>} : memref<36x256xf32, #tpu.memory_space<vmem>>, vector<4x256xf32>,
    %c0_47 = arith.constant 0 : index
    %c0_48 = arith.constant 0 : index
    %c144 = arith.constant 144 : index
    %47 = vector.load %arg6[%c0_47, %c0_48, %c144] : memref<1x4x512xf32, #tpu.memory_space<vmem>>, vector<1x4x256xf32>
    %48 = vector.shape_cast %47 : vector<1x4x256xf32> to vector<4x256xf32>
    %c28 = arith.constant 28 : index
    %c0_49 = arith.constant 0 : index
    %49 = vector.load %arg7[%c28, %c0_49] : memref<36x256xf32, #tpu.memory_space<vmem>>, vector<4x256xf32>
    tpu.vector_store %arg7[%c28, %c0_49], %48 {strides = array<i32>} : memref<36x256xf32, #tpu.memory_space<vmem>>, vector<4x256xf32>,
    %c0_50 = arith.constant 0 : index
    %c0_51 = arith.constant 0 : index
    %c145 = arith.constant 145 : index
    %50 = vector.load %arg6[%c0_50, %c0_51, %c145] : memref<1x4x512xf32, #tpu.memory_space<vmem>>, vector<1x4x256xf32>
    %51 = vector.shape_cast %50 : vector<1x4x256xf32> to vector<4x256xf32>
    %c2_52 = arith.constant 2 : index
    %c0_53 = arith.constant 0 : index
    %c0_54 = arith.constant 0 : index
    %52 = vector.load %arg4[%c2_52, %c0_53, %c0_54] : memref<3x1x256xf32, #tpu.memory_space<vmem>>, vector<1x1x256xf32>
    %53 = vector.shape_cast %52 : vector<1x1x256xf32> to vector<1x256xf32>
    %54 = vector.broadcast %53 : vector<1x256xf32> to vector<4x256xf32>
    %55 = arith.mulf %51, %54 : vector<4x256xf32>
    %c32 = arith.constant 32 : index
    %c0_55 = arith.constant 0 : index
    %56 = vector.load %arg7[%c32, %c0_55] : memref<36x256xf32, #tpu.memory_space<vmem>>, vector<4x256xf32>
    tpu.vector_store %arg7[%c32, %c0_55], %55 {strides = array<i32>} : memref<36x256xf32, #tpu.memory_space<vmem>>, vector<4x256xf32>,
    %c0_56 = arith.constant 0 : index
    %c0_57 = arith.constant 0 : index
    %57 = vector.load %arg2[%c0_56, %c0_57] : memref<8x36xf32, #tpu.memory_space<vmem>>, vector<8x36xf32>
    %c0_58 = arith.constant 0 : index
    %c0_59 = arith.constant 0 : index
    %58 = vector.load %arg7[%c0_58, %c0_59] : memref<36x256xf32, #tpu.memory_space<vmem>>, vector<36x256xf32>
    %cst_60 = arith.constant dense<0.000000e+00> : vector<8x256xf32>
    %59 = tpu.matmul %57, %58, %cst_60 {dimension_numbers = #tpu.dot_dimension_numbers<[1], [0], [0], [1], [0, 0, 1, 1], [], []>} : vector<8x36xf32>, vector<36x256xf32>, vector<8x256xf32> -> vector<8x256xf32>
    %c0_61 = arith.constant 0 : index
    %c0_62 = arith.constant 0 : index
    %60 = vector.load %arg3[%c0_61, %c0_62] : memref<8x1xf32, #tpu.memory_space<vmem>>, vector<8x1xf32>
    %61 = vector.broadcast %60 : vector<8x1xf32> to vector<8x256xf32>
    %62 = arith.addf %59, %61 : vector<8x256xf32>
    %63 = vector.extract_strided_slice %62 {offsets = [0, 0], sizes = [4, 256], strides = [1, 1]} : vector<8x256xf32> to vector<4x256xf32>
    %64 = math.tanh %63 : vector<4x256xf32>
    %65 = vector.extract_strided_slice %62 {offsets = [4, 0], sizes = [4, 256], strides = [1, 1]} : vector<8x256xf32> to vector<4x256xf32>
    %66 = arith.negf %65 : vector<4x256xf32>
    %67 = math.exp %66 : vector<4x256xf32>
    %cst_63 = arith.constant 1.000000e+00 : f32
    %68 = vector.broadcast %cst_63 : f32 to vector<4x256xf32>
    %69 = arith.addf %68, %67 : vector<4x256xf32>
    %70 = arith.divf %68, %69 : vector<4x256xf32>
    %71 = arith.mulf %70, %64 : vector<4x256xf32>
    %c0_64 = arith.constant 0 : index
    %c0_65 = arith.constant 0 : index
    %c0_66 = arith.constant 0 : index
    %72 = vector.load %arg5[%c0_64, %c0_65, %c0_66] : memref<1x4x256xf32, #tpu.memory_space<vmem>>, vector<1x4x256xf32>
    %73 = vector.shape_cast %72 : vector<1x4x256xf32> to vector<4x256xf32>
    %74 = vector.shape_cast %71 : vector<4x256xf32> to vector<1x4x256xf32>
    tpu.vector_store %arg5[%c0_64, %c0_65, %c0_66], %74 {strides = array<i32>} : memref<1x4x256xf32, #tpu.memory_space<vmem>>, vector<1x4x256xf32>,
    return
  }
  func.func @transform_0(%arg0: i32) -> (i32, i32, i32) {
    %c0_i32 = arith.constant 0 : i32
    %c0_i32_0 = arith.constant 0 : i32
    %c0_i32_1 = arith.constant 0 : i32
    return %arg0, %c0_i32, %c0_i32_0 : i32, i32, i32
  }
  func.func @transform_1(%arg0: i32) -> (i32, i32) {
    %c0_i32 = arith.constant 0 : i32
    %c0_i32_0 = arith.constant 0 : i32
    %c0_i32_1 = arith.constant 0 : i32
    return %c0_i32, %c0_i32_0 : i32, i32
  }
  func.func @transform_2(%arg0: i32) -> (i32, i32) {
    %c0_i32 = arith.constant 0 : i32
    %c0_i32_0 = arith.constant 0 : i32
    %c0_i32_1 = arith.constant 0 : i32
    return %c0_i32, %c0_i32_0 : i32, i32
  }
  func.func @transform_3(%arg0: i32) -> (i32, i32, i32) {
    %c0_i32 = arith.constant 0 : i32
    %c0_i32_0 = arith.constant 0 : i32
    %c0_i32_1 = arith.constant 0 : i32
    %c0_i32_2 = arith.constant 0 : i32
    return %c0_i32, %c0_i32_0, %c0_i32_1 : i32, i32, i32
  }
  func.func @transform_4(%arg0: i32) -> (i32, i32, i32) {
    %c0_i32 = arith.constant 0 : i32
    %c0_i32_0 = arith.constant 0 : i32
    %c0_i32_1 = arith.constant 0 : i32
    return %arg0, %c0_i32, %c0_i32_0 : i32, i32, i32
  }
}

</mosaic_0001>

<bundles_post_ra>
// kernel: tpu_custom_call.1
= control target key start
LH: loop header
LB: loop body
LE: loop exit
PB: predicated region body
PF: predicated region fallthrough
CT: control target
= control target key end

     0   :  { %9 = vsyncpa [#allocation5], 0  ;;  %s1169_s0 = inlined_call_operand.hbm [shape: f32[2,4,256], index: 0, kind: input, shape index: {}]   ;;  %s1170_s1 = inlined_call_operand.vmem [shape: f32[8,36], index: 1, kind: input, shape index: {}]   ;;  %s1171_s2 = inlined_call_operand.vmem [shape: f32[8,1], index: 2, kind: input, shape index: {}]   ;;  %s1172_s3 = inlined_call_operand.vmem [shape: f32[3,1,256], index: 3, kind: input, shape index: {}]   ;;  %s1173_s4 = inlined_call_operand.hbm [shape: f32[2,4,256], index: 4, kind: output, shape index: {}]  }
   0x1   :  { %11 = vsyncpa [#allocation5 + $0x1], 0 }
   0x2   :  { %12 = vsyncpa [#allocation6], 0 }
   0x3   :  { %14 = vsyncpa [#allocation6 + $0x1], 0  ;;  %s927_s15 = smov 0   ;;  %s929_s16 = smov 0  }
   0x4   :  { %s931_s17 = smov 0   ;;  %s933_s18 = smov 0  }
   0x5 LB: > { %s948_s19 = sadd.s32 4294967295, %s888_s18   ;;  %s698_s20 = sadd.s32 4294967294, %s888_s18   ;;  %s888_s18 = sphi %s933_s18, %s1190_s18   ;;  %s884_s17 = sphi %s931_s17, %s1189_s17   ;;  %s880_s16 = sphi %s929_s16, %s1188_s16   ;;  %s876_s15 = sphi %s927_s15, %s1187_s15  }
   0x6   : > { %s952_s21 = sadd.s32 1, %s888_s18   ;;  %s27_s22 = sadd.s32 1, %s884_s17 }
   0x7   : > { %s24_s23 = ssub.s32 %s888_s18, %s952_s21  ;;  %p34_p0 = scmp.ne.s32.totalorder %s884_s17, %s880_s16 }
   0x8   : > { %p25_p1 = scmp.eq.s32.totalorder %s24_s23, 0  ;;  %p35_p2 = scmp.eq.s32.totalorder %s888_s18, 0 }
   0x9   : > { %p40_p3 = scmp.ne.s32.totalorder %s880_s16, %s876_s15  ;;  %p41_p4 = scmp.eq.s32.totalorder %s948_s19, 0 }
   0xa   : > { %s964_s24 = scalar_select %p25_p1, %s884_s17, %s27_s22  }
   0xb   : > { %p966_p5 = por %p35_p2, %p34_p0  ;;  %p970_p6 = por %p41_p4, %p40_p3 }
   0xc   : > { %p127_p7 = scmp.eq.s32.totalorder %s948_s19, 1  ;;  %p133_p8 = scmp.eq.s32.totalorder %s698_s20, 1 }
   0xd   : > { %s1177_s26 = scalar_select %p970_p6, 1, 0 }
   0xe   : > { %p734_p10 = scmp.lt.s32.totalorder %s888_s18, 2  ;;  %p977_p11 = por %p127_p7, %p34_p0 }
   0xf   : > { %p981_p12 = por %p133_p8, %p40_p3  ;;  %s162_s29 = sand.u32 1, %s884_s17  }
  0x10   : > { %s1178_s27 = scalar_select %p977_p11, 1, 0 }
  0x11   : > { %s1179_s28 = scalar_select %p981_p12, 1, 0 }
  0x12   : > { %s720_s30 = sshll.u32 %s888_s18, 7  ;;  %s701_s5 = sshll.u32 %s162_s29, 3 }
  0x13   : > { %s990_s8 = scalar_lea.hbm %s1169_s0, %s720_s30  ;;  %s166_s9 = scalar_lea.vmem [#allocation4], %s701_s5 }
  0x14   : > { %s174_s10 = sshll.u32 %s166_s9, 4  ;;  %p994_p13 = pnand %p734_p10, %p966_p5  ;;  %s998_s10 = int_to_ptr.vmem [resolvable:$true] %s174_s10 }
  0x15   : > { %s163_s12 = scalar_lea.sflag [#allocation5], %s162_s29  ;;  %s796_s13 = scalar_lea.hbm %s990_s8, 128 }
  0x16   : > { %p797_p2 = scmp.ne.s32.totalorder %s990_s8, %s796_s13  ;;  %p798_p3 = pneg %p994_p13 }
  0x17   : > { %s801_s22 = scalar_lea.hbm %s1169_s0, 256  ;;  %p802_p5 = scmp.lt.s32.totalorder %s990_s8, %s1169_s0 }
  0x18   : > { %p799_p4 = pnand %p798_p3, %p797_p2  ;;  %p803_p8 = scmp.lt.s32.totalorder %s801_s22, %s796_s13 }
  0x1a   : > { %p800_p7 = pneg %p799_p4  ;;  %p804_p10 = por %p803_p8, %p802_p5 }
  0x1c   : > { %p805_p9 = pnand %p804_p10, %p800_p7 }
  0x1e   : > { %808 = shalt.err (!%p805_p9)
}
  0x1f   : > { %s809_s29 = scalar_lea.vmem %s998_s10, 128  ;;  %s890_s30 = smov [#allocation4]  }
  0x20   : > { %p810_p0 = scmp.ne.s32.totalorder %s998_s10, %s809_s29  ;;  %s814_s5 = sshll.u32 %s890_s30, 4  ;;  %s815_s5 = int_to_ptr.vmem [resolvable:$false] %s814_s5 }
  0x21   : > { %s816_s6 = scalar_lea.vmem %s815_s5, 256  ;;  %p817_p4 = scmp.lt.s32.totalorder %s998_s10, %s815_s5 }
  0x22   : > { %p812_p1 = pnand %p810_p0, %p798_p3  ;;  %p818_p12 = scmp.lt.s32.totalorder %s816_s6, %s809_s29 }
  0x24   : > { %p813_p2 = pneg %p812_p1  ;;  %p819_p11 = por %p818_p12, %p817_p4 }
  0x26   : > { %p820_p6 = pnand %p819_p11, %p813_p2 }
  0x28   : > { %823 = shalt.err (!%p820_p6)
}
  0x29   : > { %729 = dma.hbm_to_vmem [thread:$0]  (!%p994_p13), %s990_s8, 128, %s998_s10, %s163_s12  }
  0x2a   : > { %p1181_p9 = scmp.lt.s32.totalorder %s888_s18, 3  ;;  %p1182_p7 = scmp.ge.s32.totalorder %s888_s18, 1 }
  0x2c   : > { %p180_p0 = pnand %p1182_p7, %p1181_p9 }
  0x2d   : > { %s1025_s7 = sand.u32 (!%p180_p0), 1, %s880_s16   ;;  %p1183_p6 = scmp.ne.s32.totalorder (!%p180_p0), %s1177_s26, 0 }
  0x2e   : > { %183 = sbr.rel (%p180_p0) target bundleno = 588 (0x24c), region = 36  ;;  %s705_s9 = sshll.u32 (!%p180_p0), %s1025_s7, 3 }
  0x2f   : > { %s186_s13 = scalar_lea.sflag (!%p180_p0), [#allocation5], %s1025_s7  ;;  %s189_s11 = scalar_lea.vmem (!%p180_p0), [#allocation4], %s705_s9 }
  0x33   : > { %867 = dma.done.wait (%p1183_p6), %s186_s13, 128  }
  0x34   : > { %869 = vsyncadd (%p1183_p6), %s186_s13, 4294967168  ;;  %v222_v0 = vlaneseq  ;;  %v891_v1 = vmov 0.0   ;;  %v709_v5 = vld [vmem:[%s1172_s3 + $0x4] sm:$0x3]  ;;  %v398_v7 = vld [vmem:[%s1172_s3] sm:$0x3] }
  0x35   : > { %215 = vst [vmem:[#allocation2 + $0xc] sm:$0xf] %v891_v1  ;;  %214 = vst [vmem:[#allocation2] sm:$0xf] %v891_v1  ;;  %579 = vmatprep.mubr.f32.mxu0 %v891_v1  ;;  %v708_v6 = vld [vmem:[%s1172_s3 + $0x4] sm:$0x3] }
  0x36   : > { %v223_v2 = vshrl.u32 %v222_v0, 7  ;;  %v707_v12 = vld [vmem:[%s1172_s3 + $0x4] sm:$0x3]  ;;  %v220_v13 = vld [vmem:[%s1172_s3] sm:$0x3]  ;;  %s892_s6 = smov 17  }
  0x37   : > { %v316_v18 = vld [vmem:[%s1172_s3] sm:$0x3]  ;;  %s893_s13 = smov 1   ;;  %s895_s8 = smov 113   ;;  %vm249_vm0 = vcmask 138240   ;;  %vm307_vm1 = vcmask 121856  }
  0x38   : > { %v224_v3 = vsub.s32 0, %v223_v2  ;;  %v228_v4 = vsub.s32 1, %v223_v2  ;;  %v1053_v19 = vld [vmem:[%s189_s11] sm:$0xff]  ;;  %s894_s11 = smov 15   ;;  %s896_s10 = smov 111   ;;  %vm330_vm2 = vcmask 1039360  }
  0x39   : > { %217 = vst [vmem:[#allocation2 + $0x4] sm:$0xff] %v1053_v19  ;;  %357 = vst [vmem:[#allocation3 + $0x48] sm:$0xf] %v1053_v19  ;;  %s897_s12 = smov 127   ;;  %s898_s14 = smov 112   ;;  %v436_v31 = vcombine.low %v1053_v19, %v1053_v19  ;;  %vm444_vm3 = vcmask 916480   ;;  %v355_v60 = vcombine.high %v1053_v19, %v1053_v19 }
  0x3a   : > { %v458_v8 = vrot.slane %v709_v5, %v224_v3  ;;  %v462_v9 = vrot.slane %v709_v5, %v228_v4  ;;  %v366_v10 = vrot.slane %v708_v6, %v224_v3  ;;  %v370_v11 = vrot.slane %v708_v6, %v228_v4  ;;  %s899_s20 = smov 16   ;;  %s721_s29 = sshll.u32 %s948_s19, 7 }
  0x3b   : > { %v403_v14 = vrot.slane %v398_v7, %v224_v3  ;;  %v407_v15 = vrot.slane %v398_v7, %v228_v4  ;;  %v283_v16 = vrot.slane %v707_v12, %v224_v3  ;;  %v287_v17 = vrot.slane %v707_v12, %v228_v4  ;;  %358 = vst [vmem:[#allocation3 + $0x28] sm:$0xf] %v355_v60  ;;  %s213_s30 = scalar_lea.vmem [#allocation7], %s705_s9  ;;  %p1184_p12 = scmp.ne.s32.totalorder %s1178_s27, 0 }
  0x3c   : > { %v463_v20 = vcombine.low %v458_v8, %v462_v9  ;;  %v371_v21 = vcombine.low %v366_v10, %v370_v11  ;;  %v225_v23 = vrot.slane %v220_v13, %v224_v3  ;;  %v229_v24 = vrot.slane %v220_v13, %v228_v4  ;;  %v779_v30 = vld [vmem:[#allocation2 + $0xc] ss:$0 sps:$4 sm:$0xff]   ;;  %s628_s5 = sshll.u32 %s213_s30, 4  ;;  %s629_s5 = int_to_ptr.vmem [resolvable:$true] %s628_s5 }
  0x3d   : > { %v408_v22 = vcombine.low %v403_v14, %v407_v15  ;;  %v288_v25 = vcombine.low %v283_v16, %v287_v17  ;;  %v321_v26 = vrot.slane %v316_v18, %v224_v3  ;;  %v325_v27 = vrot.slane %v316_v18, %v228_v4  ;;  %v452_v35 = vld [vmem:[#allocation2 + $0xc] sm:$0xf] }
  0x3e   : > { %464 = vrot.lane.b32.xlu0 %v463_v20, %s892_s6  ;;  %372 = vrot.lane.b32.xlu1 %v371_v21, %s893_s13  ;;  %v230_v28 = vcombine.low %v225_v23, %v229_v24  ;;  %v397_v40 = vld [vmem:[#allocation2 + $0xc] sm:$0xf]  ;;  %vm346_vm4 = vcmask 7168   ;;  %vm292_vm5 = vcmask 924672   ;;  %vm268_vm6 = vcmask 130048  }
  0x3f   : > { %v326_v29 = vcombine.low %v321_v26, %v325_v27  ;;  %v360_v0 = vld [vmem:[#allocation2 + $0xc] sm:$0xf]  ;;  %vm234_vm7 = vcmask 908288   ;;  %v900_v24 = vmov 0   ;;  %vm508_vm8 = vcmask 1043456  }
  0x40   : > { %v781_v32 = vld [vmem:[#allocation2 + $0x8] ss:$0 sps:$4 sm:$0xff]   ;;  %v1067_v33 = vld [vmem:[#allocation2] sm:$0xff]  ;;  %778 = vset.pattern.permute.xlu0 %v900_v24  ;;  %vm504_vm9 = vcmask 293888  }
  0x41   : > { %v276_v42 = vld [vmem:[#allocation2 + $0x8] sm:$0xf]  ;;  %v260_v23 = vcombine.low %v1067_v33, %v1067_v33 }
  0x42   : > { %409 = vrot.lane.b32.xlu0 %v408_v22, %s894_s11  ;;  %289 = vrot.lane.b32.xlu1 %v288_v25, %s895_s8  ;;  %v219_v49 = vld [vmem:[#allocation2 + $0x8] sm:$0xf]  ;;  %v498_v25 = vld [vmem:[%s1171_s2] sm:$0xff] }
  0x43   : > { %v315_v3 = vld [vmem:[#allocation2 + $0x8] sm:$0xf] }
  0x46   : > { %231 = vrot.lane.b32.xlu1 %v230_v28, %s896_s10  ;;  %327 = vrot.lane.b32.xlu0 %v326_v29, %s897_s12 }
  0x4a   : > { %442 = vrot.lane.b32.xlu0 %v779_v30, %s898_s14  ;;  %440 = vrot.lane.b32.xlu1 %v1053_v19, %s898_s14 }
  0x4e   : > { %438 = vrot.lane.b32.xlu0 %v436_v31, %s898_s14  ;;  %266 = vrot.lane.b32.xlu1 %v781_v32, %s899_s20 }
  0x52   : > { %264 = vrot.lane.b32.xlu0 %v1067_v33, %s899_s20 }
  0xb0   : > { %v465_v34 = vpop.permute.xlu0 %464  ;;  %v373_v36 = vpop.permute.xlu1 %372 }
  0xb1   : > { %v466_v37 = vrot.slane %v465_v34, 4  ;;  %v374_v55 = vrot.slane %v373_v36, 4 }
  0xb3   : > { %v471_v38 = vmul.f32 %v466_v37, %v452_v35  ;;  %v467_v47 = vsel %vm249_vm0, %v466_v37, %v465_v34  ;;  %v375_v1 = vsel %vm346_vm4, %v374_v55, %v373_v36  ;;  %v379_v8 = vmul.f32 %v374_v55, %v360_v0 }
  0xb4   : > { %v410_v39 = vpop.permute.xlu0 %409  ;;  %v290_v41 = vpop.permute.xlu1 %289  ;;  %v470_v53 = vmul.f32 %v467_v47, %v1053_v19  ;;  %v378_v7 = vmul.f32 %v375_v1, %v1053_v19 }
  0xb5   : > { %v411_v43 = vrot.slane %v410_v39, 4  ;;  %v291_v44 = vrot.slane %v290_v41, 4  ;;  %479 = vrot.lane.b32.xlu1 %v471_v38, %s896_s10  ;;  %v383_v14 = vcombine.low %v379_v8, %v379_v8 }
  0xb6   : > { %v474_v16 = vcombine.high %v470_v53, %v470_v53 }
  0xb7   : > { %v416_v45 = vmul.f32 %v411_v43, %v397_v40  ;;  %v297_v46 = vmul.f32 %v291_v44, %v276_v42  ;;  %v412_v56 = vsel %vm307_vm1, %v411_v43, %v410_v39  ;;  %v293_v2 = vsel %vm292_vm5, %v291_v44, %v290_v41 }
  0xb8   : > { %v232_v48 = vpop.permute.xlu1 %231  ;;  %v328_v50 = vpop.permute.xlu0 %327  ;;  %v415_v62 = vmul.f32 %v412_v56, %v1053_v19  ;;  %v296_v9 = vmul.f32 %v293_v2, %v1067_v33  ;;  %v382_v19 = vcombine.low %v378_v7, %v378_v7 }
  0xb9   : > { %v233_v51 = vrot.slane %v232_v48, 4  ;;  %v329_v52 = vrot.slane %v328_v50, 4  ;;  %305 = vrot.lane.b32.xlu1 %v297_v46, %s894_s11  ;;  %424 = vrot.lane.b32.xlu0 %v416_v45, %s895_s8 }
  0xba   : > { %v419_v15 = vcombine.high %v415_v62, %v415_v62  ;;  %v300_v20 = vcombine.high %v296_v9, %v296_v9 }
  0xbb   : > { %v239_v54 = vmul.f32 %v233_v51, %v219_v49  ;;  %v331_v57 = vsel %vm330_vm2, %v329_v52, %v328_v50  ;;  %v335_v10 = vmul.f32 %v329_v52, %v315_v3  ;;  %v235_v17 = vsel %vm234_vm7, %v233_v51, %v232_v48  ;;  %v487_v3 = vld [vmem:[%s1170_s1] sm:$0xff] }
  0xbc   : > { %v443_v58 = vpop.permute.xlu0 %442  ;;  %v441_v59 = vpop.permute.xlu1 %440  ;;  %v334_v63 = vmul.f32 %v331_v57, %v1067_v33  ;;  %v238_v18 = vmul.f32 %v1067_v33, %v235_v17 }
  0xbd   : > { %247 = vrot.lane.b32.xlu1 %v239_v54, %s892_s6  ;;  %475 = vrot.lane.b32.xlu0 %v470_v53, %s896_s10  ;;  %v446_v61 = vsel %vm444_vm3, %v441_v59, %v443_v58  ;;  %v339_v13 = vcombine.low %v335_v10, %v335_v10 }
  0xbe   : > { %450 = vst [vmem:[#allocation3 + $0x20] sm:$0xf0] %v446_v61  ;;  %v338_v21 = vcombine.low %v334_v63, %v334_v63  ;;  %v242_v22 = vcombine.high %v238_v18, %v238_v18 }
  0xc0   : > { %v439_v4 = vpop.permute.xlu0 %438  ;;  %v267_v6 = vpop.permute.xlu1 %266 }
  0xc1   : > { %420 = vrot.lane.b32.xlu1 %v415_v62, %s895_s8  ;;  %342 = vrot.lane.b32.xlu0 %v334_v63, %s893_s13  ;;  %v445_v5 = vsel %vm444_vm3, %v439_v4, %v441_v59 }
  0xc2   : > { %449 = vst [vmem:[#allocation3 + $0x8] sm:$0xf0] %v445_v5 }
  0xc4   : > { %v1092_v11 = vpop.permute.xlu0 %264 }
  0xc5   : > { %386 = vrot.lane.b32.xlu1 %v378_v7, %s897_s12  ;;  %301 = vrot.lane.b32.xlu0 %v296_v9, %s894_s11  ;;  %v270_v12 = vsel %vm268_vm6, %v1092_v11, %v267_v6 }
  0xc6   : > { %274 = vst [vmem:[#allocation3] sm:$0xf0] %v270_v12 }
  0xc9   : > { %344 = vrot.lane.b32.xlu1 %v339_v13, %s893_s13  ;;  %388 = vrot.lane.b32.xlu0 %v383_v14, %s897_s12 }
  0xcd   : > { %422 = vrot.lane.b32.xlu1 %v419_v15, %s895_s8  ;;  %477 = vrot.lane.b32.xlu0 %v474_v16, %s896_s10  ;;  %s614_s8 = scalar_lea.sflag [#allocation6], %s1025_s7  ;;  %s824_s10 = scalar_lea.vmem %s629_s5, 128 }
  0xce   : > { %p825_p11 = scmp.ne.s32.totalorder %s629_s5, %s824_s10 }
  0xd0   : > { %p826_p13 = pnand %p825_p11, %p1184_p12 }
  0xd1   : > { %384 = vrot.lane.b32.xlu1 %v382_v19, %s897_s12  ;;  %303 = vrot.lane.b32.xlu0 %v300_v20, %s894_s11  ;;  %s626_s11 = scalar_lea.hbm %s1173_s4, %s721_s29  ;;  %s901_s12 = smov [#allocation7]  }
  0xd2   : > { %p827_p1 = pneg %p826_p13  ;;  %s828_s19 = sshll.u32 %s901_s12, 4  ;;  %s829_s19 = int_to_ptr.vmem [resolvable:$false] %s828_s19 }
  0xd3   : > { %s830_s9 = scalar_lea.vmem %s829_s19, 256  ;;  %p831_p3 = scmp.lt.s32.totalorder %s629_s5, %s829_s19 }
  0xd4   : > { %p832_p5 = scmp.lt.s32.totalorder %s830_s9, %s824_s10 }
  0xd5   : > { %340 = vrot.lane.b32.xlu1 %v338_v21, %s893_s13  ;;  %245 = vrot.lane.b32.xlu0 %v242_v22, %s892_s6 }
  0xd6   : > { %p833_p8 = por %p832_p5, %p831_p3 }
  0xd8   : > { %p834_p10 = pnand %p833_p8, %p827_p1 }
  0xd9   : > { %262 = vrot.lane.b32.xlu1 %v260_v23, %s899_s20  ;;  %243 = vrot.lane.b32.xlu0 %v238_v18, %s892_s6 }
  0xdd   : > { %501 = vperm.xlu0 %778, %v498_v25  }
 0x127   : > { %v480_v26 = vpop.permute.xlu1 %479 }
 0x12b   : > { %v306_v27 = vpop.permute.xlu1 %305  ;;  %v425_v28 = vpop.permute.xlu0 %424 }
 0x12f   : > { %v248_v29 = vpop.permute.xlu1 %247  ;;  %v476_v30 = vpop.permute.xlu0 %475 }
 0x133   : > { %v421_v31 = vpop.permute.xlu1 %420  ;;  %v343_v32 = vpop.permute.xlu0 %342 }
 0x137   : > { %v387_v33 = vpop.permute.xlu1 %386  ;;  %v302_v34 = vpop.permute.xlu0 %301 }
 0x13b   : > { %v345_v35 = vpop.permute.xlu1 %344  ;;  %v389_v36 = vpop.permute.xlu0 %388 }
 0x13c   : > { %v348_v37 = vsel %vm346_vm4, %v343_v32, %v345_v35  ;;  %v391_v38 = vsel %vm330_vm2, %v387_v33, %v389_v36 }
 0x13d   : > { %352 = vst [vmem:[#allocation3 + $0x10] sm:$0xf0] %v348_v37  ;;  %395 = vst [vmem:[#allocation3 + $0x28] sm:$0xf0] %v391_v38 }
 0x13f   : > { %v423_v39 = vpop.permute.xlu1 %422  ;;  %v478_v40 = vpop.permute.xlu0 %477 }
 0x140   : > { %v426_v41 = vsel %vm292_vm5, %v421_v31, %v423_v39  ;;  %v427_v42 = vsel %vm292_vm5, %v423_v39, %v425_v28  ;;  %v481_v43 = vsel %vm234_vm7, %v476_v30, %v478_v40  ;;  %v482_v44 = vsel %vm234_vm7, %v478_v40, %v480_v26 }
 0x141   : > { %430 = vst [vmem:[#allocation3 + $0x8] sm:$0xf] %v426_v41  ;;  %431 = vst [vmem:[#allocation3 + $0x20] sm:$0xf] %v427_v42 }
 0x142   : > { %485 = vst [vmem:[#allocation3 + $0x40] sm:$0xf] %v481_v43  ;;  %486 = vst [vmem:[#allocation3 + $0x38] sm:$0xf] %v482_v44 }
 0x143   : > { %v385_v45 = vpop.permute.xlu1 %384  ;;  %v304_v46 = vpop.permute.xlu0 %303 }
 0x144   : > { %v390_v47 = vsel %vm330_vm2, %v385_v45, %v387_v33  ;;  %v308_v48 = vsel %vm307_vm1, %v302_v34, %v304_v46  ;;  %v309_v49 = vsel %vm307_vm1, %v304_v46, %v306_v27  ;;  %v493_v62 = vld [vmem:[#allocation3 + $0x28] sm:$0xff] }
 0x145   : > { %394 = vst [vmem:[#allocation3 + $0x48] sm:$0xf0] %v390_v47  ;;  %312 = vst [vmem:[#allocation3 + $0x18] sm:$0xf] %v308_v48 }
 0x146   : > { %313 = vst [vmem:[#allocation3 + $0x10] sm:$0xf] %v309_v49 }
 0x147   : > { %v341_v50 = vpop.permute.xlu1 %340  ;;  %v246_v51 = vpop.permute.xlu0 %245 }
 0x148   : > { %v347_v52 = vsel %vm346_vm4, %v341_v50, %v343_v32  ;;  %v251_v53 = vsel %vm249_vm0, %v246_v51, %v248_v29  ;;  %v495_v56 = vld [vmem:[#allocation3 + $0x20] sm:$0xff]  ;;  %v494_v59 = vld [vmem:[#allocation3 + $0x8] sm:$0xff] }
 0x149   : > { %v497_v54 = vld [vmem:[#allocation3 + $0x38] sm:$0xf]  ;;  %v496_v55 = vld [vmem:[#allocation3 + $0x40] sm:$0xf]  ;;  %351 = vst [vmem:[#allocation3 + $0x18] sm:$0xf0] %v347_v52 }
 0x14a   : > { %255 = vst [vmem:[#allocation3] sm:$0xf] %v251_v53  ;;  %710 = vmatprep.subr.msk.mxu0 %vm508_vm8, %v497_v54 }
 0x14b   : > { %711 = vmatpush1.msk.msra.mxu0 %vm508_vm8, %v496_v55  ;;  %v263_v57 = vpop.permute.xlu1 %262  ;;  %v244_v58 = vpop.permute.xlu0 %243 }
 0x14c   : > { %539 = vmatprep.subr.mxu0 %v495_v56  ;;  %v269_v60 = vsel %vm268_vm6, %v263_v57, %v1092_v11  ;;  %v250_v61 = vsel %vm249_vm0, %v244_v58, %v246_v51  ;;  %v492_v63 = vld [vmem:[#allocation3 + $0x48] sm:$0xff] }
 0x14d   : > { %540 = vmatpush1.msra.mxu0 %v494_v59  ;;  %273 = vst [vmem:[#allocation3 + $0x30] sm:$0xf0] %v269_v60  ;;  %254 = vst [vmem:[#allocation3 + $0x30] sm:$0xf] %v250_v61  ;;  %v491_v0 = vld [vmem:[#allocation3 + $0x10] sm:$0xff] }
 0x14e   : > { %541 = vmatprep.subr.mxu0 %v493_v62 }
 0x14f   : > { %542 = vmatpush1.msra.mxu0 %v492_v63 }
 0x150   : > { %543 = vmatprep.subr.mxu0 %v491_v0  ;;  %v490_v1 = vld [vmem:[#allocation3 + $0x18] sm:$0xff] }
 0x151   : > { %v489_v2 = vld [vmem:[#allocation3] sm:$0xff]  ;;  %544 = vmatpush1.msra.mxu0 %v490_v1 }
 0x152   : > { %545 = vmatprep.subr.mxu0 %v489_v2 }
 0x154   : > { %v488_v4 = vld [vmem:[#allocation3 + $0x30] sm:$0xff] }
 0x155   : > { %546 = vmatpush1.msra.mxu0 %v488_v4 }
 0x156   : > { %712 = vmatmul.mubr.msk.f32.vlgmr.msra.gmra.mxu0 %vm504_vm9, %v487_v3 }
 0x158   : > { %v502_v5 = vpop.permute.xlu0 %501 }
 0x216   : > { %v581_v6 = vpop.f32.mrf.mxu0 }
 0x217   : > { %v582_v7 = vadd.f32 %v581_v6, %v502_v5 }
 0x218   : > { %v583_v8 = vpop.f32.mrf.mxu0 }
 0x219   : > { %v713_v9 = vmul.f32 -1.442695, %v582_v7  ;;  %v584_v10 = vadd.f32 %v583_v8, %v502_v5 }
 0x21b   : > { %784 = vpow2.f32 %v713_v9  ;;  %v714_v11 = vmul.f32 -1.442695, %v584_v10 }
 0x21d   : > { %786 = vpow2.f32 %v714_v11 }
 0x21e   : > { %788 = vtanh.f32 %v582_v7 }
 0x21f   : > { %790 = vtanh.f32 %v584_v10 }
 0x228   : > { %v785_v12 = vpop.eup %784 }
 0x229   : > { %v594_v13 = vadd.f32 1.0, %v785_v12 }
 0x22a   : > { %v787_v14 = vpop.eup %786 }
 0x22b   : > { %792 = vrcp.f32 %v594_v13  ;;  %v595_v15 = vadd.f32 1.0, %v787_v14  ;;  %v789_v16 = vpop.eup %788 }
 0x22c   : > { %v791_v17 = vpop.eup %790  ;;  %v602_v19 = vrot.slane %v789_v16, 4 }
 0x22d   : > { %794 = vrcp.f32 %v595_v15  ;;  %v603_v20 = vrot.slane %v791_v17, 4 }
 0x238   : > { %v793_v18 = vpop.eup %792 }
 0x239   : > { %v606_v22 = vmul.f32 %v793_v18, %v602_v19 }
 0x23a   : > { %v795_v21 = vpop.eup %794 }
 0x23b   : > { %v607_v23 = vmul.f32 %v795_v21, %v603_v20 }
 0x23d   : > { %v610_v24 = vcombine.high %v606_v22, %v607_v23 }
 0x23f   : > { %612 = vst [vmem:[%s213_s30] sm:$0xff] %v610_v24 }
 0x240   : > { %837 = shalt.err (!%p834_p10)
}
 0x241   : > { %s838_s14 = scalar_lea.hbm %s626_s11, 128  ;;  %s842_s22 = scalar_lea.hbm %s1173_s4, 256 }
 0x242   : > { %p839_p2 = scmp.ne.s32.totalorder %s626_s11, %s838_s14  ;;  %p843_p7 = scmp.lt.s32.totalorder %s626_s11, %s1173_s4 }
 0x243   : > { %p844_p0 = scmp.lt.s32.totalorder %s842_s22, %s838_s14 }
 0x244   : > { %p840_p4 = pnand %p839_p2, %p1184_p12 }
 0x245   : > { %p845_p6 = por %p844_p0, %p843_p7 }
 0x246   : > { %p841_p9 = pneg %p840_p4 }
 0x248   : > { %p846_p11 = pnand %p845_p6, %p841_p9 }
 0x24a   : > { %849 = shalt.err (!%p846_p11)
}
 0x24b   : > { %724 = dma.vmem_to_hbm [thread:$0]  (%p1184_p12), %s629_s5, 128, %s626_s11, %s614_s8  }
 0x24c PF: > { %s640_s25 = sand.u32 1, %s876_s15   ;;  %p1185_p13 = scmp.ne.s32.totalorder %s1179_s28, 0 }
 0x24d   : > { %p1186_p1 = scmp.ge.s32.totalorder %s888_s18, 2  ;;  %s641_s29 = scalar_lea.sflag [#allocation6], %s640_s25 }
 0x24f   : > { %p731_p3 = pnand %p1186_p1, %p1185_p13 }
 0x251   : > { %p732_p5 = pneg %p731_p3 }
 0x253   : > { %871 = dma.done.wait (%p732_p5), %s641_s29, 128  }
 0x254   : > { %873 = vsyncadd (%p732_p5), %s641_s29, 4294967168  ;;  %p17_p8 = scmp.ge.s32.totalorder %s952_s21, 4   ;;  %s1187_s15 = smov %s880_s16 }
 0x255   : > { %s1188_s16 = smov %s884_s17  ;;  %s1189_s17 = smov %s964_s24 }
 0x256   : > { %s1190_s18 = smov %s952_s21  ;;  %19 = sbr.rel (!%p17_p8) target bundleno = 5 (0x5), region = 82 }
 0x25b   :  { %646 = vsyncpa [#allocation5], 1 }
 0x25c   :  { %648 = vsyncpa [#allocation5 + $0x1], 1 }
 0x25d   :  { %649 = vsyncpa [#allocation6], 1 }
 0x25e   :  { %651 = vsyncpa [#allocation6 + $0x1], 1 }

</bundles_post_ra>
